<compile_context>
chip_gen: v6e
topology: v6e:2x2x1
jax: 0.10.0
libtpu: 0.0.40
codegen_flags: <defaults>
</compile_context>

<pallas_src>
import functools

import jax
import jax.numpy as jnp
from jax import lax
from jax.experimental import pallas as pl
from jax.experimental.pallas import tpu as pltpu


def _a_net_kernel(x_ref, w1_ref, b1_ref, dw_ref, db_ref, out_ref, *, chunk, fc1_bf16):
    # Layout (batch on the lane axis):
    #   x_ref  : (IN, tb)  input activations, feature-major
    #   w1_ref : (H, IN)   fc1.weight (PyTorch (out, in) layout)
    #   b1_ref : (H, 1)    fc1.bias
    #   dw_ref : (H, 1)    fc2.weight[1] - fc2.weight[0]
    #   db_ref : (1, 1)    fc2.bias[1]   - fc2.bias[0]
    #   out_ref: (2, tb)   softmax probabilities (row 0 = class 0, row 1 = class 1)
    n_in = x_ref.shape[0]
    tb = x_ref.shape[1]
    nch = tb // chunk

    chain_dtype = jnp.bfloat16 if fc1_bf16 else jnp.float32
    w1 = w1_ref[...].astype(chain_dtype)     # (H, IN)   tiny; loaded once per step
    b1 = b1_ref[...]                         # (H, 1)    f32
    dw = dw_ref[...]                         # (H, 1)    f32
    db = db_ref[...]                         # (1, 1)    f32

    def compute_chunk(c):
        off = c * chunk
        if chunk % 128 == 0 and nch > 1:
            off = pl.multiple_of(off, 128)   # aligned, unmasked vector accesses
        x = x_ref[:, pl.ds(off, chunk)].astype(chain_dtype)        # (IN, chunk)

        # fc1: unrolled VPU broadcast-FMA chain over K = 4 input features.
        acc = w1[:, 0:1] * x[0:1, :]
        for k in range(1, n_in):
            acc = acc + w1[:, k : k + 1] * x[k : k + 1, :]
        h = jnp.maximum(acc.astype(jnp.float32) + b1, 0.0)         # (H, chunk) f32

        # fc2 + 2-class softmax, specialized.
        d = jnp.sum(h * dw, axis=0, keepdims=True) + db            # (1, chunk)
        p0 = pl.reciprocal(1.0 + jnp.exp(d), approx=False)         # EUP exp + div
        out_ref[0:1, pl.ds(off, chunk)] = p0
        out_ref[1:2, pl.ds(off, chunk)] = 1.0 - p0

    if nch == 1:
        compute_chunk(0)
    else:
        def body(c, carry):
            compute_chunk(c)
            return carry
        lax.fori_loop(0, nch, body, 0, unroll=True if nch <= 8 else 8)


def _round_up(a, m):
    return ((a + m - 1) // m) * m


def a_net_forward(x, w1, b1, w2, b2, *, block_batch=16384, chunk=1024,
                  x_feature_major=False, out_feature_major=False, fc1_bf16=False):
    """A_Net forward.

    x : (B, 4) (default) or (4, B) if x_feature_major=True.
    Params in PyTorch layout: w1 (20, 4), b1 (20,), w2 (2, 20), b2 (2,).
    Returns (B, 2) softmax probs (or (2, B) if out_feature_major=True).
    Set x_feature_major / out_feature_major when the surrounding graph can keep the
    (features, batch) layout — this removes both wrapper-side XLA transpose passes.
    fc1_bf16: run the fc1 FMA chain in bf16 (v6e/v7x only; keep False on v5e).
    """
    if x_feature_major:
        xt = jnp.asarray(x, jnp.float32)                 # already (IN, B)
        n_in, B = xt.shape
    else:
        xf = jnp.asarray(x, jnp.float32)
        B, n_in = xf.shape
        xt = xf.T                                        # single XLA transpose pass

    H = w1.shape[0]
    n_cls = w2.shape[0]
    assert n_cls == 2, "kernel specializes the 2-class softmax"
    assert w1.shape == (H, n_in) and w2.shape == (n_cls, H)

    w1f = jnp.asarray(w1, jnp.float32)                               # (H, IN)
    b1c = jnp.asarray(b1, jnp.float32).reshape(H, 1)                 # (H, 1)
    w2f = jnp.asarray(w2, jnp.float32)
    b2f = jnp.asarray(b2, jnp.float32)
    dw = (w2f[1, :] - w2f[0, :]).reshape(H, 1)                       # (H, 1)
    db = (b2f[1] - b2f[0]).reshape(1, 1)                             # (1, 1)

    # --- batch tile: large (amortize per-step pipeline overhead), lane-aligned, and
    #     >=2 grid steps when B allows (v7x megacore). No padding: the last block may
    #     be partial; Pallas masks its writeback.
    tb = block_batch
    if B <= tb:
        half = _round_up(pl.cdiv(B, 2), 128)
        tb = half if half < B else B                     # single full-array block if tiny
    grid = (pl.cdiv(B, tb),)

    # --- lane-chunk for the in-kernel loop: largest multiple of 128 (<= chunk) that
    #     divides tb, so (H, chunk) intermediates stay in vregs (v5e: one vst slot).
    if tb <= chunk or tb % 128 != 0:
        ch = tb
    else:
        ch = max(128, (min(chunk, tb) // 128) * 128)
        while tb % ch != 0:
            ch -= 128

    out_t = pl.pallas_call(
        functools.partial(_a_net_kernel, chunk=ch, fc1_bf16=fc1_bf16),
        out_shape=jax.ShapeDtypeStruct((n_cls, B), jnp.float32),
        grid=grid,
        in_specs=[
            pl.BlockSpec((n_in, tb), lambda i: (0, i)),   # x tiles stream through VMEM
            pl.BlockSpec((H, n_in), lambda i: (0, 0)),    # weights stay resident
            pl.BlockSpec((H, 1), lambda i: (0, 0)),
            pl.BlockSpec((H, 1), lambda i: (0, 0)),
            pl.BlockSpec((1, 1), lambda i: (0, 0)),
        ],
        out_specs=pl.BlockSpec((n_cls, tb), lambda i: (0, i)),
        compiler_params=pltpu.CompilerParams(
            dimension_semantics=("parallel",),            # v7x: shard batch over 2 TCs
        ),
    )(xt, w1f, b1c, dw, db)

    if out_feature_major:
        return out_t                                     # (2, B)
    return out_t.T                                       # (B, 2)


def init_params(key):
    k1, k2, k3, k4 = jax.random.split(key, 4)
    # fc1: Linear(4, 20); weight explicitly ~ N(0, 0.1), bias = PyTorch default U(+-1/sqrt(4))
    w1 = jax.random.normal(k1, (20, 4), jnp.float32) * 0.1
    b1 = jax.random.uniform(k2, (20,), jnp.float32, -0.5, 0.5)
    # fc2: Linear(20, 2); weight ~ N(0, 0.1), bias = U(+-1/sqrt(20))
    w2 = jax.random.normal(k3, (2, 20), jnp.float32) * 0.1
    bound2 = 1.0 / (20.0 ** 0.5)
    b2 = jax.random.uniform(k4, (2,), jnp.float32, -bound2, bound2)
    return w1, b1, w2, b2


def reference(x, w1, b1, w2, b2):
    h = jnp.maximum(x @ w1.T + b1, 0.0)
    logits = h @ w2.T + b2
    return jax.nn.softmax(logits, axis=1)


if __name__ == "__main__":
    key = jax.random.PRNGKey(0)
    kx, kp = jax.random.split(key)
    w1, b1, w2, b2 = init_params(kp)

    # 1) Small batch: single full-array block.
    batch = 8
    x = jax.random.normal(kx, (batch, 4), jnp.float32)
    out = jax.block_until_ready(a_net_forward(x, w1, b1, w2, b2))
    ref = reference(x, w1, b1, w2, b2)
    assert out.shape == (batch, 2)
    assert jnp.allclose(out, ref, atol=1e-5, rtol=1e-5)
    assert jnp.allclose(jnp.sum(out, axis=1), 1.0, atol=1e-5)

    # 2) Medium batch: 2 grid steps (tb=512), partial masked last block (no pad),
    #    and chunked inner fori_loop (chunk=128 -> 4 chunks per step).
    batch2 = 1000
    x2 = jax.random.normal(jax.random.PRNGKey(1), (batch2, 4), jnp.float32)
    out2 = jax.block_until_ready(a_net_forward(x2, w1, b1, w2, b2, chunk=128))
    ref2 = reference(x2, w1, b1, w2, b2)
    assert out2.shape == (batch2, 2)
    assert jnp.allclose(out2, ref2, atol=1e-5, rtol=1e-5)

    # 3) Feature-major I/O path (layout pushed upstream: no wrapper transposes).
    out3 = jax.block_until_ready(
        a_net_forward(x2.T, w1, b1, w2, b2,
                      x_feature_major=True, out_feature_major=True))
    assert out3.shape == (2, batch2)
    assert jnp.allclose(out3.T, ref2, atol=1e-5, rtol=1e-5)

    print("KERNEL_OK")
</pallas_src>

<mosaic_0001>
module attributes {stable_mosaic.version = 11 : i64} {
  func.func @_a_net_kernel(%arg0: i32, %arg1: memref<4x8xf32, #tpu.memory_space<vmem>>, %arg2: memref<20x4xf32, #tpu.memory_space<vmem>>, %arg3: memref<20x1xf32, #tpu.memory_space<vmem>>, %arg4: memref<20x1xf32, #tpu.memory_space<vmem>>, %arg5: memref<1x1xf32, #tpu.memory_space<vmem>>, %arg6: memref<2x8xf32, #tpu.memory_space<vmem>>) attributes {dimension_semantics = [#tpu.dimension_semantics<parallel>], iteration_bounds = array<i64: 1>, scalar_prefetch = 0 : i64, scratch_operands = 0 : i64, tpu.core_type = #tpu.core_type<tc>, window_params = [{transform_indices = @transform_0, window_bounds = array<i64: 4, 8>}, {pipeline_mode = #tpu.pipeline_mode<synchronous>, transform_indices = @transform_1, window_bounds = array<i64: 20, 4>}, {pipeline_mode = #tpu.pipeline_mode<synchronous>, transform_indices = @transform_2, window_bounds = array<i64: 20, 1>}, {pipeline_mode = #tpu.pipeline_mode<synchronous>, transform_indices = @transform_3, window_bounds = array<i64: 20, 1>}, {pipeline_mode = #tpu.pipeline_mode<synchronous>, transform_indices = @transform_4, window_bounds = array<i64: 1, 1>}, {transform_indices = @transform_5, window_bounds = array<i64: 2, 8>}]} {
    %c0 = arith.constant 0 : index
    %c0_0 = arith.constant 0 : index
    %0 = vector.load %arg2[%c0, %c0_0] : memref<20x4xf32, #tpu.memory_space<vmem>>, vector<20x4xf32>
    %c0_1 = arith.constant 0 : index
    %c0_2 = arith.constant 0 : index
    %1 = vector.load %arg3[%c0_1, %c0_2] : memref<20x1xf32, #tpu.memory_space<vmem>>, vector<20x1xf32>
    %c0_3 = arith.constant 0 : index
    %c0_4 = arith.constant 0 : index
    %2 = vector.load %arg4[%c0_3, %c0_4] : memref<20x1xf32, #tpu.memory_space<vmem>>, vector<20x1xf32>
    %c0_5 = arith.constant 0 : index
    %c0_6 = arith.constant 0 : index
    %3 = vector.load %arg5[%c0_5, %c0_6] : memref<1x1xf32, #tpu.memory_space<vmem>>, vector<1x1xf32>
    %c0_7 = arith.constant 0 : index
    %c0_8 = arith.constant 0 : index
    %4 = vector.load %arg1[%c0_7, %c0_8] : memref<4x8xf32, #tpu.memory_space<vmem>>, vector<4x8xf32>
    %5 = vector.extract_strided_slice %0 {offsets = [0, 0], sizes = [20, 1], strides = [1, 1]} : vector<20x4xf32> to vector<20x1xf32>
    %6 = vector.extract_strided_slice %4 {offsets = [0, 0], sizes = [1, 8], strides = [1, 1]} : vector<4x8xf32> to vector<1x8xf32>
    %7 = vector.broadcast %5 : vector<20x1xf32> to vector<20x8xf32>
    %8 = vector.broadcast %6 : vector<1x8xf32> to vector<20x8xf32>
    %9 = arith.mulf %7, %8 : vector<20x8xf32>
    %10 = vector.extract_strided_slice %0 {offsets = [0, 1], sizes = [20, 1], strides = [1, 1]} : vector<20x4xf32> to vector<20x1xf32>
    %11 = vector.extract_strided_slice %4 {offsets = [1, 0], sizes = [1, 8], strides = [1, 1]} : vector<4x8xf32> to vector<1x8xf32>
    %12 = vector.broadcast %10 : vector<20x1xf32> to vector<20x8xf32>
    %13 = vector.broadcast %11 : vector<1x8xf32> to vector<20x8xf32>
    %14 = arith.mulf %12, %13 : vector<20x8xf32>
    %15 = arith.addf %9, %14 : vector<20x8xf32>
    %16 = vector.extract_strided_slice %0 {offsets = [0, 2], sizes = [20, 1], strides = [1, 1]} : vector<20x4xf32> to vector<20x1xf32>
    %17 = vector.extract_strided_slice %4 {offsets = [2, 0], sizes = [1, 8], strides = [1, 1]} : vector<4x8xf32> to vector<1x8xf32>
    %18 = vector.broadcast %16 : vector<20x1xf32> to vector<20x8xf32>
    %19 = vector.broadcast %17 : vector<1x8xf32> to vector<20x8xf32>
    %20 = arith.mulf %18, %19 : vector<20x8xf32>
    %21 = arith.addf %15, %20 : vector<20x8xf32>
    %22 = vector.extract_strided_slice %0 {offsets = [0, 3], sizes = [20, 1], strides = [1, 1]} : vector<20x4xf32> to vector<20x1xf32>
    %23 = vector.extract_strided_slice %4 {offsets = [3, 0], sizes = [1, 8], strides = [1, 1]} : vector<4x8xf32> to vector<1x8xf32>
    %24 = vector.broadcast %22 : vector<20x1xf32> to vector<20x8xf32>
    %25 = vector.broadcast %23 : vector<1x8xf32> to vector<20x8xf32>
    %26 = arith.mulf %24, %25 : vector<20x8xf32>
    %27 = arith.addf %21, %26 : vector<20x8xf32>
    %28 = vector.broadcast %1 : vector<20x1xf32> to vector<20x8xf32>
    %29 = arith.addf %27, %28 : vector<20x8xf32>
    %cst = arith.constant 0.000000e+00 : f32
    %30 = vector.broadcast %cst : f32 to vector<20x8xf32>
    %31 = arith.maximumf %29, %30 : vector<20x8xf32>
    %32 = vector.broadcast %2 : vector<20x1xf32> to vector<20x8xf32>
    %33 = arith.mulf %31, %32 : vector<20x8xf32>
    %cst_9 = arith.constant dense<0.000000e+00> : vector<8xf32>
    %34 = vector.multi_reduction <add>, %33, %cst_9 [0] : vector<20x8xf32> to vector<8xf32>
    %35 = vector.shape_cast %34 : vector<8xf32> to vector<1x8xf32>
    %36 = vector.broadcast %3 : vector<1x1xf32> to vector<1x8xf32>
    %37 = arith.addf %35, %36 : vector<1x8xf32>
    %38 = math.exp %37 : vector<1x8xf32>
    %cst_10 = arith.constant 1.000000e+00 : f32
    %39 = vector.broadcast %cst_10 : f32 to vector<1x8xf32>
    %40 = arith.addf %39, %38 : vector<1x8xf32>
    %41 = tpu.reciprocal %40 : vector<1x8xf32> -> vector<1x8xf32>
    %c0_11 = arith.constant 0 : index
    %c0_12 = arith.constant 0 : index
    %42 = vector.load %arg6[%c0_11, %c0_12] : memref<2x8xf32, #tpu.memory_space<vmem>>, vector<1x8xf32>
    tpu.vector_store %arg6[%c0_11, %c0_12], %41 {strides = array<i32>} : memref<2x8xf32, #tpu.memory_space<vmem>>, vector<1x8xf32>,
    %cst_13 = arith.constant 1.000000e+00 : f32
    %43 = vector.broadcast %cst_13 : f32 to vector<1x8xf32>
    %44 = arith.subf %43, %41 : vector<1x8xf32>
    %c1 = arith.constant 1 : index
    %c0_14 = arith.constant 0 : index
    %45 = vector.load %arg6[%c1, %c0_14] : memref<2x8xf32, #tpu.memory_space<vmem>>, vector<1x8xf32>
    tpu.vector_store %arg6[%c1, %c0_14], %44 {strides = array<i32>} : memref<2x8xf32, #tpu.memory_space<vmem>>, vector<1x8xf32>,
    return
  }
  func.func @transform_0(%arg0: i32) -> (i32, i32) {
    %c0_i32 = arith.constant 0 : i32
    %c0_i32_0 = arith.constant 0 : i32
    return %c0_i32, %arg0 : i32, i32
  }
  func.func @transform_1(%arg0: i32) -> (i32, i32) {
    %c0_i32 = arith.constant 0 : i32
    %c0_i32_0 = arith.constant 0 : i32
    %c0_i32_1 = arith.constant 0 : i32
    return %c0_i32, %c0_i32_0 : i32, i32
  }
  func.func @transform_2(%arg0: i32) -> (i32, i32) {
    %c0_i32 = arith.constant 0 : i32
    %c0_i32_0 = arith.constant 0 : i32
    %c0_i32_1 = arith.constant 0 : i32
    return %c0_i32, %c0_i32_0 : i32, i32
  }
  func.func @transform_3(%arg0: i32) -> (i32, i32) {
    %c0_i32 = arith.constant 0 : i32
    %c0_i32_0 = arith.constant 0 : i32
    %c0_i32_1 = arith.constant 0 : i32
    return %c0_i32, %c0_i32_0 : i32, i32
  }
  func.func @transform_4(%arg0: i32) -> (i32, i32) {
    %c0_i32 = arith.constant 0 : i32
    %c0_i32_0 = arith.constant 0 : i32
    %c0_i32_1 = arith.constant 0 : i32
    return %c0_i32, %c0_i32_0 : i32, i32
  }
  func.func @transform_5(%arg0: i32) -> (i32, i32) {
    %c0_i32 = arith.constant 0 : i32
    %c0_i32_0 = arith.constant 0 : i32
    return %c0_i32, %arg0 : i32, i32
  }
}

</mosaic_0001>

<bundles_post_ra>
// kernel: tpu_custom_call.1
= control target key start
LH: loop header
LB: loop body
LE: loop exit
PB: predicated region body
PF: predicated region fallthrough
CT: control target
= control target key end

     0   :  { %s325_s0 = inlined_call_operand.vmem [shape: f32[4,8], index: 0, kind: input, shape index: {}]   ;;  %s326_s1 = inlined_call_operand.vmem [shape: f32[20,4], index: 1, kind: input, shape index: {}]   ;;  %s327_s2 = inlined_call_operand.vmem [shape: f32[20,1], index: 2, kind: input, shape index: {}]   ;;  %s328_s3 = inlined_call_operand.vmem [shape: f32[20,1], index: 3, kind: input, shape index: {}]   ;;  %s329_s4 = inlined_call_operand.<no memory space> [shape: f32[1,1], index: 4, kind: input, shape index: {}]   ;;  %s330_s5 = inlined_call_operand.hbm [shape: f32[2,8], index: 5, kind: output, shape index: {}]  }
   0x1   :  { %v10_v0 = vstv %s329_s4 }
   0x2   :  { %11 = vst [vmem:[#allocation2] sm:$0x1] %v10_v0 }
   0x3   :  { %v23_v1 = vld [vmem:[%s326_s1] sm:$0xff]  ;;  %v244_v2 = vmov 2   ;;  %v245_v3 = vmov 1   ;;  %v24_v4 = vld [vmem:[%s326_s1 + $0x8] sm:$0xff] }
   0x4   :  { %212 = vset.pattern.permute.xlu0 %v244_v2  ;;  %211 = vset.pattern.permute.xlu1 %v245_v3 }
   0x5   :  { %79 = vperm.xlu0 %212, %v23_v1   ;;  %57 = vperm.xlu1 %211, %v23_v1  }
   0x6   :  { %12 = vsyncpa [#allocation4], 0  ;;  %v246_v5 = vmov 3   ;;  %v25_v6 = vld [vmem:[%s326_s1 + $0x10] sm:$0xf]  ;;  %v247_v7 = vmov 0   ;;  %v49_v17 = vlaneseq }
   0x7   :  { %v26_v8 = vld [vmem:[%s327_s2] sm:$0xff]  ;;  %v31_v10 = vld [vmem:[%s328_s3 + $0x10] sm:$0xf]  ;;  %v27_v11 = vld [vmem:[%s327_s2 + $0x8] sm:$0xff]  ;;  %vm161_vm0 = vcmask 64512   ;;  %vm165_vm1 = vcmask 60416  }
   0x8   :  { %v29_v9 = vld [vmem:[%s328_s3] sm:$0xff]  ;;  %v28_v12 = vld [vmem:[%s327_s2 + $0x10] sm:$0xf]  ;;  %v30_v13 = vld [vmem:[%s328_s3 + $0x8] sm:$0xff]  ;;  %v309_v20 = vshrl.u32 %v49_v17, 7  ;;  %vm188_vm2 = vcmask 57344  }
   0x9   :  { %214 = vset.pattern.permute.xlu0 %v246_v5  ;;  %61 = vperm.xlu1 %211, %v24_v4   ;;  %v32_v14 = vld [vmem:[#allocation2] sm:$0x1] }
   0xa   :  { %101 = vperm.xlu0 %214, %v23_v1   ;;  %v51_v22 = vsub.s32 0, %v309_v20  ;;  %v70_v23 = vsub.s32 1, %v309_v20  ;;  %v33_v25 = vld [vmem:[%s325_s0] sm:$0xf]  ;;  %v92_v26 = vsub.s32 2, %v309_v20  ;;  %v114_v32 = vsub.s32 3, %v309_v20 }
   0xb   :  { %s248_s0 = smov [#allocation3]  }
   0xc   :  { %v52_v27 = vrot.slane %v33_v25, %v51_v22  ;;  %v71_v29 = vrot.slane %v33_v25, %v70_v23  ;;  %v93_v31 = vrot.slane %v33_v25, %v92_v26  ;;  %v115_v37 = vrot.slane %v33_v25, %v114_v32  ;;  %s198_s3 = sshll.u32 %s248_s0, 4  ;;  %s199_s3 = int_to_ptr.vmem [resolvable:$true] %s198_s3 }
   0xd   :  { %65 = vperm.xlu1 %211, %v25_v6   ;;  %s222_s12 = scalar_lea.vmem %s199_s3, 32  ;;  %p227_p1 = scmp.lt.s32.totalorder %s199_s3, %s199_s3 }
   0xe   :  { %215 = vset.pattern.permute.xlu0 %v247_v7  ;;  %p223_p0 = scmp.ne.s32.totalorder %s199_s3, %s222_s12  ;;  %p228_p2 = scmp.lt.s32.totalorder %s222_s12, %s222_s12 }
   0xf   :  { %36 = vperm.xlu0 %215, %v23_v1  }
  0x10   :  { %p229_p3 = por %p228_p2, %p227_p1 }
  0x11   :  { %213 = vset.pattern.permute.xlu1 %v244_v2 }
  0x12   :  { %83 = vperm.xlu1 %213, %v24_v4   ;;  %p230_p4 = pnand %p229_p3, %p223_p0 }
  0x13   :  { %41 = vperm.xlu0 %215, %v24_v4  }
  0x16   :  { %87 = vperm.xlu1 %213, %v25_v6  }
  0x17   :  { %46 = vperm.xlu0 %215, %v25_v6  }
  0x1a   :  { %216 = vset.pattern.permute.xlu1 %v246_v5 }
  0x1b   :  { %124 = vperm.xlu0 %215, %v26_v8   ;;  %105 = vperm.xlu1 %216, %v24_v4  }
  0x1f   :  { %145 = vperm.xlu0 %215, %v29_v9   ;;  %109 = vperm.xlu1 %216, %v25_v6  }
  0x23   :  { %155 = vperm.xlu0 %215, %v31_v10   ;;  %217 = vset.pattern.permute.xlu1 %v247_v7 }
  0x24   :  { %129 = vperm.xlu1 %217, %v27_v11  }
  0x28   :  { %134 = vperm.xlu1 %217, %v28_v12  }
  0x2c   :  { %150 = vperm.xlu1 %217, %v30_v13  }
  0x30   :  { %176 = vperm.xlu1 %217, %v32_v14  }
  0x80   :  { %v58_v15 = vpop.permute.xlu1 %57  ;;  %v80_v16 = vpop.permute.xlu0 %79 }
  0x81   :  { %v72_v35 = vmul.f32 %v71_v29, %v58_v15  ;;  %v94_v36 = vmul.f32 %v93_v31, %v80_v16 }
  0x84   :  { %v62_v18 = vpop.permute.xlu1 %61 }
  0x85   :  { %v102_v19 = vpop.permute.xlu0 %101  ;;  %v73_v42 = vmul.f32 %v71_v29, %v62_v18 }
  0x86   :  { %v116_v43 = vmul.f32 %v115_v37, %v102_v19 }
  0x88   :  { %v66_v21 = vpop.permute.xlu1 %65 }
  0x89   :  { %v74_v46 = vmul.f32 %v71_v29, %v66_v21 }
  0x8a   :  { %v37_v24 = vpop.permute.xlu0 %36 }
  0x8b   :  { %v53_v33 = vmul.f32 %v52_v27, %v37_v24 }
  0x8d   :  { %v84_v28 = vpop.permute.xlu1 %83  ;;  %v75_v38 = vadd.f32 %v72_v35, %v53_v33 }
  0x8e   :  { %v42_v30 = vpop.permute.xlu0 %41  ;;  %v95_v50 = vmul.f32 %v93_v31, %v84_v28 }
  0x8f   :  { %v54_v40 = vmul.f32 %v52_v27, %v42_v30  ;;  %v97_v45 = vadd.f32 %v94_v36, %v75_v38 }
  0x91   :  { %v88_v34 = vpop.permute.xlu1 %87  ;;  %v76_v47 = vadd.f32 %v73_v42, %v54_v40  ;;  %v119_v52 = vadd.f32 %v116_v43, %v97_v45 }
  0x92   :  { %v47_v39 = vpop.permute.xlu0 %46  ;;  %v96_v54 = vmul.f32 %v93_v31, %v88_v34 }
  0x93   :  { %v55_v44 = vmul.f32 %v52_v27, %v47_v39  ;;  %v98_v57 = vadd.f32 %v95_v50, %v76_v47 }
  0x95   :  { %v77_v51 = vadd.f32 %v74_v46, %v55_v44 }
  0x96   :  { %v106_v41 = vpop.permute.xlu1 %105  ;;  %v125_v49 = vpop.permute.xlu0 %124 }
  0x97   :  { %v117_v53 = vmul.f32 %v115_v37, %v106_v41  ;;  %v137_v55 = vadd.f32 %v125_v49, %v119_v52  ;;  %v99_v60 = vadd.f32 %v96_v54, %v77_v51 }
  0x99   :  { %v120_v59 = vadd.f32 %v117_v53, %v98_v57  ;;  %v140_v62 = vmax.f32 %v137_v55, 0.0 }
  0x9a   :  { %v110_v48 = vpop.permute.xlu1 %109  ;;  %v146_v61 = vpop.permute.xlu0 %145 }
  0x9b   :  { %v118_v56 = vmul.f32 %v115_v37, %v110_v48  ;;  %v158_v3 = vmul.f32 %v146_v61, %v140_v62 }
  0x9d   :  { %v121_v0 = vadd.f32 %v118_v56, %v99_v60  ;;  %v162_v10 = vsel %vm161_vm0, %v158_v3, 0.0 }
  0x9e   :  { %v156_v6 = vpop.permute.xlu0 %155 }
  0x9f   :  { %v130_v58 = vpop.permute.xlu1 %129 }
  0xa0   :  { %v138_v63 = vadd.f32 %v130_v58, %v120_v59 }
  0xa2   :  { %v141_v4 = vmax.f32 %v138_v63, 0.0 }
  0xa3   :  { %v135_v1 = vpop.permute.xlu1 %134 }
  0xa4   :  { %v139_v2 = vadd.f32 %v135_v1, %v121_v0 }
  0xa6   :  { %v142_v5 = vmax.f32 %v139_v2, 0.0 }
  0xa7   :  { %v151_v7 = vpop.permute.xlu1 %150 }
  0xa8   :  { %v160_v8 = vmul.f32 %v156_v6, %v142_v5  ;;  %v159_v9 = vmul.f32 %v151_v7, %v141_v4 }
  0xaa   :  { %v163_v11 = vsel %vm161_vm0, %v159_v9, 0.0  ;;  %v166_v13 = vsel %vm165_vm1, %v160_v8, 0.0 }
  0xab   :  { %v164_v12 = vadd.f32 %v163_v11, %v162_v10  ;;  %v177_v19 = vpop.permute.xlu1 %176 }
  0xac   :  { %v182_v24 = vrot.slane %v177_v19, %v51_v22 }
  0xad   :  { %v167_v14 = vadd.f32 %v166_v13, %v164_v12 }
  0xaf   :  { %v168_v15 = vrot.slane %v167_v14, 4 }
  0xb1   :  { %v169_v16 = vadd.f32 %v168_v15, %v167_v14 }
  0xb3   :  { %v170_v17 = vrot.slane %v169_v16, 2 }
  0xb5   :  { %v171_v18 = vadd.f32 %v170_v17, %v169_v16 }
  0xb7   :  { %v172_v21 = vrot.slane %v171_v18, 1 }
  0xb9   :  { %v173_v23 = vadd.f32 %v172_v21, %v171_v18 }
  0xbb   :  { %v183_v25 = vadd.f32 %v182_v24, %v173_v23 }
  0xbd   :  { %v184_v26 = vmul.f32 1.442695, %v183_v25 }
  0xbf   :  { %218 = vpow2.f32 %v184_v26 }
  0xcc   :  { %v219_v27 = vpop.eup %218 }
  0xcd   :  { %v186_v28 = vadd.f32 1.0, %v219_v27 }
  0xcf   :  { %220 = vrcp.f32 %v186_v28 }
  0xdc   :  { %v221_v29 = vpop.eup %220 }
  0xdd   :  { %189 = vst.msk [vmem:[#allocation3] sm:$0x1] %vm188_vm2, %v221_v29  ;;  %v190_v30 = vsub.f32 1.0, %v221_v29 }
  0xdf   :  { %191 = vst.msk [vmem:[#allocation3 + $0x1] sm:$0x1] %vm188_vm2, %v190_v30 }
  0xe0   :  { %233 = shalt.err (!%p230_p4)
}
  0xe1   :  { %201 = dma.vmem_to_hbm [thread:$0]  %s199_s3, 32, %s330_s5, [#allocation4]  }
  0xe2   :  { %242 = dma.done.wait [#allocation4], 32  }
  0xe3   :  { %243 = vsyncadd [#allocation4], 4294967264 }
  0xe4   :  { %205 = vsyncpa [#allocation4], 1 }

</bundles_post_ra>
